<compile_context>
chip_gen: v7x
topology: tpu7x:2x2x1
jax: 0.10.0
libtpu: 0.0.40
codegen_flags: <defaults>
</compile_context>

<pallas_src>
import functools

import jax
import jax.numpy as jnp
from jax.experimental import pallas as pl
from jax.experimental.pallas import tpu as pltpu


# --------------------------------------------------------------------------- #
# Kernel
# --------------------------------------------------------------------------- #
def stacked_ae_kernel(x_ref,
                      w1_ref, b1_ref,
                      w2_ref, b2_ref,
                      w3_ref, b3_ref,
                      w4_ref, b4_ref,
                      o_ref,
                      *, out_chunk):
    """One batch-tile of the stacked autoencoder forward (all 4 layers fused).

    Weights are tiny (hidden dims 20/10) and stay fully VMEM-resident; only
    the (tb, M_pad) x / out tiles stream through HBM every grid step.  The
    final (wide) layer is computed in `out_chunk`-lane chunks so the f32
    result never materializes at full width before the cast + store.
    """
    def sigmoid(z):
        # Single EUP op (tanh); identical to 1/(1+exp(-z)) but saturating.
        return 0.5 * jnp.tanh(0.5 * z) + 0.5

    x = x_ref[...]                                                            # (tb, M_pad)

    h1 = sigmoid(jnp.dot(x, w1_ref[...],
                         preferred_element_type=jnp.float32) + b1_ref[...])   # (tb, 20)
    h2 = sigmoid(jnp.dot(h1.astype(w2_ref.dtype), w2_ref[...],
                         preferred_element_type=jnp.float32) + b2_ref[...])   # (tb, 10)
    h3 = sigmoid(jnp.dot(h2.astype(w3_ref.dtype), w3_ref[...],
                         preferred_element_type=jnp.float32) + b3_ref[...])   # (tb, 20)
    h3 = h3.astype(w4_ref.dtype)

    m_pad = o_ref.shape[1]
    for c0 in range(0, m_pad, out_chunk):                 # static loop, static slices
        out_c = jnp.dot(h3, w4_ref[:, c0:c0 + out_chunk],
                        preferred_element_type=jnp.float32)
        out_c = out_c + b4_ref[:, c0:c0 + out_chunk]
        o_ref[:, c0:c0 + out_chunk] = out_c.astype(o_ref.dtype)


# --------------------------------------------------------------------------- #
# Sizing helpers
# --------------------------------------------------------------------------- #
def _round_up(n, m):
    return -(-n // m) * m


def _vmem_capacity_bytes():
    try:
        return int(pltpu.get_tpu_info().vmem_capacity_bytes)
    except Exception:
        return 64 * 1024 * 1024                       # conservative (v7x-sized) fallback


def _pick_out_chunk(m_pad):
    """Lane-chunk width for the final layer (m_pad is a multiple of 128)."""
    if m_pad <= 512:
        return m_pad
    for c in (512, 384, 256, 128):
        if m_pad % c == 0:
            return c
    return 128


def _per_row_vmem_bytes(m_pad, io_bytes, out_chunk):
    """VMEM cost of one batch row inside the kernel:
    double-buffered x + out tiles, f32 epilogue chunk, small hidden temps."""
    tiles = 2 * m_pad * io_bytes * 2          # x tile + out tile, each double-buffered
    epilogue = out_chunk * 4                  # f32 result chunk before the cast
    hidden = (20 + 10 + 20) * 4 * 2           # h1/h2/h3 f32 temps (+ slack)
    return tiles + epilogue + hidden


def _pick_batch_tile(batch, m_pad, io_bytes, weights_bytes, out_chunk,
                     row_align, max_tb):
    """Largest batch tile whose working set fits comfortably in VMEM on this
    chip, aligned to the sublane packing of the streaming dtype, and split so
    the ("parallel",) batch grid has >=2 tiles for v7x's two TensorCores."""
    vmem = _vmem_capacity_bytes()
    per_row = _per_row_vmem_bytes(m_pad, io_bytes, out_chunk)
    fixed = 2 * weights_bytes + 4 * 1024 * 1024        # (maybe) double-buffered weights + scratch
    budget = int(vmem * 0.70) - fixed

    tb = max(row_align, min(max_tb, budget // max(per_row, 1)))
    tb = max(row_align, (tb // row_align) * row_align)

    padded_batch = _round_up(max(batch, 1), row_align)
    tb = min(tb, padded_batch)

    # If the whole (padded) batch fits in one tile but can be split, use two
    # tiles so both TensorCores get work on v7x (no-op on v5e/v6e).
    if tb >= padded_batch and padded_batch >= 2 * row_align:
        tb = _round_up(-(-padded_batch // 2), row_align)
    return int(tb)


# --------------------------------------------------------------------------- #
# Wrapper
# --------------------------------------------------------------------------- #
def stacked_ae_forward(x, params, *, tb=None, io_dtype=jnp.bfloat16, max_tb=4096):
    """Forward pass. `io_dtype` controls how the big x / out tensors (and the
    weights) are streamed; accumulation is always f32."""
    (w1, b1), (w2, b2), (w3, b3), (w4, b4) = params
    batch, nb_movies = x.shape

    io_dtype = jnp.dtype(io_dtype)
    io_bytes = io_dtype.itemsize
    row_align = 8 if io_bytes >= 4 else 16             # bf16 packs 16 sublanes / vreg

    # Pad the movie (lane) dim to a multiple of 128 -> lane-dense, unmasked stores.
    m_pad = _round_up(nb_movies, 128)
    pad_cols = m_pad - nb_movies
    out_chunk = _pick_out_chunk(m_pad)

    # PyTorch-style (out, in) weights -> (in, out) for row-major MXU matmuls.
    w1t = w1.T.astype(io_dtype)                         # (nb_movies, 20)
    w2t = w2.T.astype(io_dtype)                         # (20, 10)
    w3t = w3.T.astype(io_dtype)                         # (10, 20)
    w4t = w4.T.astype(io_dtype)                         # (20, nb_movies)
    if pad_cols:
        w1t = jnp.pad(w1t, ((0, pad_cols), (0, 0)))     # zero rows: padded x cols are inert
        w4t = jnp.pad(w4t, ((0, 0), (0, pad_cols)))     # zero cols: padded out cols sliced off
    # Biases stay f32 (added onto the f32 accumulators).
    b1r = b1.reshape(1, -1).astype(jnp.float32)
    b2r = b2.reshape(1, -1).astype(jnp.float32)
    b3r = b3.reshape(1, -1).astype(jnp.float32)
    b4r = b4.reshape(1, -1).astype(jnp.float32)
    if pad_cols:
        b4r = jnp.pad(b4r, ((0, 0), (0, pad_cols)))

    weights_bytes = sum(int(a.size) * a.dtype.itemsize
                        for a in (w1t, w2t, w3t, w4t, b1r, b2r, b3r, b4r))

    if tb is None:
        tb = _pick_batch_tile(batch, m_pad, io_bytes, weights_bytes, out_chunk,
                              row_align, max_tb)
    tb = max(row_align, (int(tb) // row_align) * row_align)

    padded = _round_up(max(batch, 1), tb)               # batch rounded up to a tile multiple
    pad_rows = padded - batch

    x_io = x.astype(io_dtype)
    if pad_rows or pad_cols:
        x_io = jnp.pad(x_io, ((0, pad_rows), (0, pad_cols)))  # zero rows/cols; sliced off below

    # VMEM limit derived from the actual footprint (per generation), with
    # headroom for Mosaic internal scratch.
    vmem = _vmem_capacity_bytes()
    footprint = _per_row_vmem_bytes(m_pad, io_bytes, out_chunk) * tb + 2 * weights_bytes
    vmem_limit = min(max(footprint + 12 * 1024 * 1024, 32 * 1024 * 1024),
                     min(int(vmem * 0.85), 100 * 1024 * 1024))

    full = lambda a: pl.BlockSpec(a.shape, lambda i: (0, 0))  # constant block index => no refetch

    flops = 2 * padded * (m_pad * 20 + 20 * 10 + 10 * 20 + 20 * m_pad)
    transcendentals = padded * (20 + 10 + 20)
    bytes_accessed = (padded * m_pad * 2 * io_bytes + weights_bytes)

    kernel = functools.partial(stacked_ae_kernel, out_chunk=out_chunk)

    out = pl.pallas_call(
        kernel,
        out_shape=jax.ShapeDtypeStruct((padded, m_pad), io_dtype),
        grid_spec=pltpu.PrefetchScalarGridSpec(
            num_scalar_prefetch=0,
            grid=(padded // tb,),
            in_specs=[
                pl.BlockSpec((tb, m_pad), lambda i: (i, 0)),   # x tile
                full(w1t), full(b1r),
                full(w2t), full(b2r),
                full(w3t), full(b3r),
                full(w4t), full(b4r),
            ],
            out_specs=pl.BlockSpec((tb, m_pad), lambda i: (i, 0)),
        ),
        compiler_params=pltpu.CompilerParams(
            dimension_semantics=("parallel",),           # megacore-shards the batch on v7x
            vmem_limit_bytes=int(vmem_limit),
        ),
        cost_estimate=pl.CostEstimate(flops=flops,
                                      transcendentals=transcendentals,
                                      bytes_accessed=bytes_accessed),
    )(x_io, w1t, b1r, w2t, b2r, w3t, b3r, w4t, b4r)

    return out[:batch, :nb_movies]


# --------------------------------------------------------------------------- #
# Reference / init / test
# --------------------------------------------------------------------------- #
def init_linear(key, in_features, out_features, dtype=jnp.float32):
    """Deterministic init mimicking PyTorch nn.Linear default (uniform +/- 1/sqrt(in))."""
    kw, kb = jax.random.split(key)
    bound = 1.0 / jnp.sqrt(jnp.asarray(in_features, dtype))
    w = jax.random.uniform(kw, (out_features, in_features), dtype,
                           minval=-bound, maxval=bound)
    b = jax.random.uniform(kb, (out_features,), dtype,
                           minval=-bound, maxval=bound)
    return w, b


def reference_forward(x, params):
    """Plain-JAX reference reproducing the PyTorch forward exactly (f32)."""
    (w1, b1), (w2, b2), (w3, b3), (w4, b4) = params
    h = jax.nn.sigmoid(x @ w1.T + b1)
    h = jax.nn.sigmoid(h @ w2.T + b2)
    h = jax.nn.sigmoid(h @ w3.T + b3)
    return h @ w4.T + b4


if __name__ == "__main__":
    # Small synthetic sizes consistent with the module: nb_movies is the
    # feature dim (deliberately NOT a multiple of 128 to exercise lane
    # padding); batch of users NOT a multiple of 16 to exercise row padding.
    nb_movies = 250
    batch = 10

    key = jax.random.PRNGKey(0)
    k_x, k1, k2, k3, k4 = jax.random.split(key, 5)

    x = jax.random.uniform(k_x, (batch, nb_movies), jnp.float32)  # ratings in [0, 1)

    params = (
        init_linear(k1, nb_movies, 20),
        init_linear(k2, 20, 10),
        init_linear(k3, 10, 20),
        init_linear(k4, 20, nb_movies),
    )

    ref = reference_forward(x, params)

    # Exact path (f32 I/O): verifies forward semantics tightly.
    out_f32 = jax.block_until_ready(stacked_ae_forward(x, params, io_dtype=jnp.float32))
    assert out_f32.shape == (batch, nb_movies)
    assert jnp.allclose(out_f32, ref, atol=1e-4, rtol=1e-4)

    # Fast path (default): bf16 streaming of x / weights / output, f32 accumulation.
    out_bf16 = jax.block_until_ready(stacked_ae_forward(x, params))
    assert out_bf16.shape == (batch, nb_movies)
    assert jnp.allclose(out_bf16.astype(jnp.float32), ref, atol=5e-2, rtol=5e-2)

    print("KERNEL_OK")
</pallas_src>

<mosaic_0001>
module attributes {stable_mosaic.version = 11 : i64} {
  func.func @stacked_ae_kernel(%arg0: i32, %arg1: memref<8x256xf32, #tpu.memory_space<vmem>>, %arg2: memref<256x20xf32, #tpu.memory_space<vmem>>, %arg3: memref<1x20xf32, #tpu.memory_space<vmem>>, %arg4: memref<20x10xf32, #tpu.memory_space<vmem>>, %arg5: memref<1x10xf32, #tpu.memory_space<vmem>>, %arg6: memref<10x20xf32, #tpu.memory_space<vmem>>, %arg7: memref<1x20xf32, #tpu.memory_space<vmem>>, %arg8: memref<20x256xf32, #tpu.memory_space<vmem>>, %arg9: memref<1x256xf32, #tpu.memory_space<vmem>>, %arg10: memref<8x256xf32, #tpu.memory_space<vmem>>) attributes {dimension_semantics = [#tpu.dimension_semantics<parallel>], iteration_bounds = array<i64: 2>, scalar_prefetch = 0 : i64, scratch_operands = 0 : i64, tpu.core_type = #tpu.core_type<tc>, window_params = [{transform_indices = @transform_0, window_bounds = array<i64: 8, 256>}, {pipeline_mode = #tpu.pipeline_mode<synchronous>, transform_indices = @transform_1, window_bounds = array<i64: 256, 20>}, {pipeline_mode = #tpu.pipeline_mode<synchronous>, transform_indices = @transform_2, window_bounds = array<i64: 1, 20>}, {pipeline_mode = #tpu.pipeline_mode<synchronous>, transform_indices = @transform_3, window_bounds = array<i64: 20, 10>}, {pipeline_mode = #tpu.pipeline_mode<synchronous>, transform_indices = @transform_4, window_bounds = array<i64: 1, 10>}, {pipeline_mode = #tpu.pipeline_mode<synchronous>, transform_indices = @transform_5, window_bounds = array<i64: 10, 20>}, {pipeline_mode = #tpu.pipeline_mode<synchronous>, transform_indices = @transform_6, window_bounds = array<i64: 1, 20>}, {pipeline_mode = #tpu.pipeline_mode<synchronous>, transform_indices = @transform_7, window_bounds = array<i64: 20, 256>}, {pipeline_mode = #tpu.pipeline_mode<synchronous>, transform_indices = @transform_8, window_bounds = array<i64: 1, 256>}, {transform_indices = @transform_9, window_bounds = array<i64: 8, 256>}]} {
    %c0 = arith.constant 0 : index
    %c0_0 = arith.constant 0 : index
    %0 = vector.load %arg1[%c0, %c0_0] : memref<8x256xf32, #tpu.memory_space<vmem>>, vector<8x256xf32>
    %c0_1 = arith.constant 0 : index
    %c0_2 = arith.constant 0 : index
    %1 = vector.load %arg2[%c0_1, %c0_2] : memref<256x20xf32, #tpu.memory_space<vmem>>, vector<256x20xf32>
    %cst = arith.constant dense<0.000000e+00> : vector<8x20xf32>
    %2 = tpu.matmul %0, %1, %cst {dimension_numbers = #tpu.dot_dimension_numbers<[1], [0], [0], [1], [0, 0, 1, 1], [], []>} : vector<8x256xf32>, vector<256x20xf32>, vector<8x20xf32> -> vector<8x20xf32>
    %c0_3 = arith.constant 0 : index
    %c0_4 = arith.constant 0 : index
    %3 = vector.load %arg3[%c0_3, %c0_4] : memref<1x20xf32, #tpu.memory_space<vmem>>, vector<1x20xf32>
    %4 = vector.broadcast %3 : vector<1x20xf32> to vector<8x20xf32>
    %5 = arith.addf %2, %4 : vector<8x20xf32>
    %cst_5 = arith.constant 5.000000e-01 : f32
    %6 = vector.broadcast %cst_5 : f32 to vector<8x20xf32>
    %7 = arith.mulf %6, %5 : vector<8x20xf32>
    %8 = math.tanh %7 : vector<8x20xf32>
    %cst_6 = arith.constant 5.000000e-01 : f32
    %9 = vector.broadcast %cst_6 : f32 to vector<8x20xf32>
    %10 = arith.mulf %9, %8 : vector<8x20xf32>
    %cst_7 = arith.constant 5.000000e-01 : f32
    %11 = vector.broadcast %cst_7 : f32 to vector<8x20xf32>
    %12 = arith.addf %10, %11 : vector<8x20xf32>
    %c0_8 = arith.constant 0 : index
    %c0_9 = arith.constant 0 : index
    %13 = vector.load %arg4[%c0_8, %c0_9] : memref<20x10xf32, #tpu.memory_space<vmem>>, vector<20x10xf32>
    %cst_10 = arith.constant dense<0.000000e+00> : vector<8x10xf32>
    %14 = tpu.matmul %12, %13, %cst_10 {dimension_numbers = #tpu.dot_dimension_numbers<[1], [0], [0], [1], [0, 0, 1, 1], [], []>} : vector<8x20xf32>, vector<20x10xf32>, vector<8x10xf32> -> vector<8x10xf32>
    %c0_11 = arith.constant 0 : index
    %c0_12 = arith.constant 0 : index
    %15 = vector.load %arg5[%c0_11, %c0_12] : memref<1x10xf32, #tpu.memory_space<vmem>>, vector<1x10xf32>
    %16 = vector.broadcast %15 : vector<1x10xf32> to vector<8x10xf32>
    %17 = arith.addf %14, %16 : vector<8x10xf32>
    %cst_13 = arith.constant 5.000000e-01 : f32
    %18 = vector.broadcast %cst_13 : f32 to vector<8x10xf32>
    %19 = arith.mulf %18, %17 : vector<8x10xf32>
    %20 = math.tanh %19 : vector<8x10xf32>
    %cst_14 = arith.constant 5.000000e-01 : f32
    %21 = vector.broadcast %cst_14 : f32 to vector<8x10xf32>
    %22 = arith.mulf %21, %20 : vector<8x10xf32>
    %cst_15 = arith.constant 5.000000e-01 : f32
    %23 = vector.broadcast %cst_15 : f32 to vector<8x10xf32>
    %24 = arith.addf %22, %23 : vector<8x10xf32>
    %c0_16 = arith.constant 0 : index
    %c0_17 = arith.constant 0 : index
    %25 = vector.load %arg6[%c0_16, %c0_17] : memref<10x20xf32, #tpu.memory_space<vmem>>, vector<10x20xf32>
    %cst_18 = arith.constant dense<0.000000e+00> : vector<8x20xf32>
    %26 = tpu.matmul %24, %25, %cst_18 {dimension_numbers = #tpu.dot_dimension_numbers<[1], [0], [0], [1], [0, 0, 1, 1], [], []>} : vector<8x10xf32>, vector<10x20xf32>, vector<8x20xf32> -> vector<8x20xf32>
    %c0_19 = arith.constant 0 : index
    %c0_20 = arith.constant 0 : index
    %27 = vector.load %arg7[%c0_19, %c0_20] : memref<1x20xf32, #tpu.memory_space<vmem>>, vector<1x20xf32>
    %28 = vector.broadcast %27 : vector<1x20xf32> to vector<8x20xf32>
    %29 = arith.addf %26, %28 : vector<8x20xf32>
    %cst_21 = arith.constant 5.000000e-01 : f32
    %30 = vector.broadcast %cst_21 : f32 to vector<8x20xf32>
    %31 = arith.mulf %30, %29 : vector<8x20xf32>
    %32 = math.tanh %31 : vector<8x20xf32>
    %cst_22 = arith.constant 5.000000e-01 : f32
    %33 = vector.broadcast %cst_22 : f32 to vector<8x20xf32>
    %34 = arith.mulf %33, %32 : vector<8x20xf32>
    %cst_23 = arith.constant 5.000000e-01 : f32
    %35 = vector.broadcast %cst_23 : f32 to vector<8x20xf32>
    %36 = arith.addf %34, %35 : vector<8x20xf32>
    %c0_24 = arith.constant 0 : index
    %c0_25 = arith.constant 0 : index
    %37 = vector.load %arg8[%c0_24, %c0_25] : memref<20x256xf32, #tpu.memory_space<vmem>>, vector<20x256xf32>
    %cst_26 = arith.constant dense<0.000000e+00> : vector<8x256xf32>
    %38 = tpu.matmul %36, %37, %cst_26 {dimension_numbers = #tpu.dot_dimension_numbers<[1], [0], [0], [1], [0, 0, 1, 1], [], []>} : vector<8x20xf32>, vector<20x256xf32>, vector<8x256xf32> -> vector<8x256xf32>
    %c0_27 = arith.constant 0 : index
    %c0_28 = arith.constant 0 : index
    %39 = vector.load %arg9[%c0_27, %c0_28] : memref<1x256xf32, #tpu.memory_space<vmem>>, vector<1x256xf32>
    %40 = vector.broadcast %39 : vector<1x256xf32> to vector<8x256xf32>
    %41 = arith.addf %38, %40 : vector<8x256xf32>
    %c0_29 = arith.constant 0 : index
    %c0_30 = arith.constant 0 : index
    %42 = vector.load %arg10[%c0_29, %c0_30] : memref<8x256xf32, #tpu.memory_space<vmem>>, vector<8x256xf32>
    tpu.vector_store %arg10[%c0_29, %c0_30], %41 {strides = array<i32>} : memref<8x256xf32, #tpu.memory_space<vmem>>, vector<8x256xf32>,
    return
  }
  func.func @transform_0(%arg0: i32) -> (i32, i32) {
    %c0_i32 = arith.constant 0 : i32
    %c0_i32_0 = arith.constant 0 : i32
    return %arg0, %c0_i32 : i32, i32
  }
  func.func @transform_1(%arg0: i32) -> (i32, i32) {
    %c0_i32 = arith.constant 0 : i32
    %c0_i32_0 = arith.constant 0 : i32
    %c0_i32_1 = arith.constant 0 : i32
    return %c0_i32, %c0_i32_0 : i32, i32
  }
  func.func @transform_2(%arg0: i32) -> (i32, i32) {
    %c0_i32 = arith.constant 0 : i32
    %c0_i32_0 = arith.constant 0 : i32
    %c0_i32_1 = arith.constant 0 : i32
    return %c0_i32, %c0_i32_0 : i32, i32
  }
  func.func @transform_3(%arg0: i32) -> (i32, i32) {
    %c0_i32 = arith.constant 0 : i32
    %c0_i32_0 = arith.constant 0 : i32
    %c0_i32_1 = arith.constant 0 : i32
    return %c0_i32, %c0_i32_0 : i32, i32
  }
  func.func @transform_4(%arg0: i32) -> (i32, i32) {
    %c0_i32 = arith.constant 0 : i32
    %c0_i32_0 = arith.constant 0 : i32
    %c0_i32_1 = arith.constant 0 : i32
    return %c0_i32, %c0_i32_0 : i32, i32
  }
  func.func @transform_5(%arg0: i32) -> (i32, i32) {
    %c0_i32 = arith.constant 0 : i32
    %c0_i32_0 = arith.constant 0 : i32
    %c0_i32_1 = arith.constant 0 : i32
    return %c0_i32, %c0_i32_0 : i32, i32
  }
  func.func @transform_6(%arg0: i32) -> (i32, i32) {
    %c0_i32 = arith.constant 0 : i32
    %c0_i32_0 = arith.constant 0 : i32
    %c0_i32_1 = arith.constant 0 : i32
    return %c0_i32, %c0_i32_0 : i32, i32
  }
  func.func @transform_7(%arg0: i32) -> (i32, i32) {
    %c0_i32 = arith.constant 0 : i32
    %c0_i32_0 = arith.constant 0 : i32
    %c0_i32_1 = arith.constant 0 : i32
    return %c0_i32, %c0_i32_0 : i32, i32
  }
  func.func @transform_8(%arg0: i32) -> (i32, i32) {
    %c0_i32 = arith.constant 0 : i32
    %c0_i32_0 = arith.constant 0 : i32
    %c0_i32_1 = arith.constant 0 : i32
    return %c0_i32, %c0_i32_0 : i32, i32
  }
  func.func @transform_9(%arg0: i32) -> (i32, i32) {
    %c0_i32 = arith.constant 0 : i32
    %c0_i32_0 = arith.constant 0 : i32
    return %arg0, %c0_i32 : i32, i32
  }
}

</mosaic_0001>

<bundles_post_ra>
// kernel: tpu_custom_call.1
= control target key start
LH: loop header
LB: loop body
LE: loop exit
PB: predicated region body
PF: predicated region fallthrough
CT: control target
= control target key end

     0   :  { %14 = vsyncpa [#allocation3], 0  ;;  %s1346_s0 = inlined_call_operand.vmem [shape: f32[16,256], index: 0, kind: input, shape index: {}]   ;;  %s1347_s1 = inlined_call_operand.vmem [shape: f32[256,20], index: 1, kind: input, shape index: {}]   ;;  %s1348_s2 = inlined_call_operand.vmem [shape: f32[1,20], index: 2, kind: input, shape index: {}]   ;;  %s1349_s3 = inlined_call_operand.vmem [shape: f32[20,10], index: 3, kind: input, shape index: {}]   ;;  %s1350_s4 = inlined_call_operand.vmem [shape: f32[1,10], index: 4, kind: input, shape index: {}]   ;;  %s1351_s5 = inlined_call_operand.vmem [shape: f32[10,20], index: 5, kind: input, shape index: {}]   ;;  %s1352_s6 = inlined_call_operand.vmem [shape: f32[1,20], index: 6, kind: input, shape index: {}]   ;;  %s1353_s7 = inlined_call_operand.vmem [shape: f32[20,256], index: 7, kind: input, shape index: {}]   ;;  %s1354_s8 = inlined_call_operand.vmem [shape: f32[1,256], index: 8, kind: input, shape index: {}]   ;;  %s1355_s9 = inlined_call_operand.hbm [shape: f32[16,256], index: 9, kind: output, shape index: {}]  }
   0x1   :  { %16 = vsyncpa [#allocation3 + $0x1], 0  ;;  %s1096_s30 = smov 0   ;;  %s1098_s10 = smov 0  }
   0x2   :  { %s1100_s11 = smov 0   ;;  %s1102_s12 = smov 0  }
   0x3 LB: > { %s1117_s13 = sadd.s32 4294967295, %s1039_s12   ;;  %s803_s14 = sadd.s32 4294967294, %s1039_s12   ;;  %s1039_s12 = sphi %s1102_s12, %s1361_s12   ;;  %s1035_s11 = sphi %s1100_s11, %s1360_s11   ;;  %s1031_s10 = sphi %s1098_s10, %s1359_s10   ;;  %s1027_s30 = sphi %s1096_s30, %s1358_s30  }
   0x4   : > { %s1121_s15 = sadd.s32 1, %s1039_s12   ;;  %s223_s16 = sadd.s32 1, %s1035_s11 }
   0x5   : > { %s220_s17 = ssub.s32 %s1039_s12, %s1121_s15  ;;  %p233_p0 = scmp.ne.s32.totalorder %s1035_s11, %s1031_s10 }
   0x6   : > { %p221_p1 = scmp.eq.s32.totalorder %s220_s17, 0  ;;  %p234_p2 = scmp.eq.s32.totalorder %s1117_s13, 1 }
   0x7   : > { %p239_p3 = scmp.ne.s32.totalorder %s1031_s10, %s1027_s30  ;;  %p240_p4 = scmp.eq.s32.totalorder %s803_s14, 1 }
   0x8   : > { %s1132_s18 = scalar_select %p221_p1, %s1035_s11, %s223_s16  }
   0x9   : > { %p1134_p5 = por %p234_p2, %p233_p0  ;;  %p1138_p6 = por %p240_p4, %p239_p3 }
   0xa   : > { %p806_p7 = scmp.ge.s32.totalorder %s1039_s12, 1  ;;  %p290_p8 = scmp.lt.s32.totalorder %s1039_s12, 3 }
   0xc   : > { %p291_p9 = pnand %p806_p7, %p290_p8 }
   0xd   : > { %v349_v0 = vld [vmem:[%s1347_s1 + $0x80] sm:$0xff] (!%p291_p9)  ;;  %v350_v1 = vld [vmem:[%s1347_s1 + $0x88] sm:$0xff] (!%p291_p9)  ;;  %p326_p10 = scmp.lt.s32.totalorder (!%p291_p9), %s1117_s13, 1  ;;  %v351_v5 = vld [vmem:[%s1347_s1 + $0x90] sm:$0xff] (!%p291_p9)  ;;  %v1041_v53 = vmov (!%p291_p9), 0.0|0.0   ;;  %v1042_v54 = vmov (!%p291_p9), 0.0  }
   0xe   : > { %294 = sbr.rel (%p291_p9) target bundleno = 973 (0x3cd), region = 56  ;;  %v333_v2 = vld [vmem:[%s1347_s1] sm:$0xff] (!%p291_p9)  ;;  %v885_v3 = vpack.c.bf16 (!%p291_p9), %v350_v1, %v349_v0  ;;  %v334_v4 = vld [vmem:[%s1347_s1 + $0x8] sm:$0xff] (!%p291_p9)  ;;  %v352_v6 = vld [vmem:[%s1347_s1 + $0x98] sm:$0xff] (!%p291_p9)  ;;  %917 = vmatprep.subr.bf16.mxu1 (!%p291_p9), %v1041_v53  ;;  %vm460_vm0 = vcmask (!%p291_p9), 1043456   ;;  %vm1043_vm1 = vmmov (!%p291_p9), 0  }
   0xf   : > { %v887_v7 = vpack.c.bf16 (!%p291_p9), %v334_v4, %v333_v2  ;;  %v889_v8 = vpack.c.bf16 (!%p291_p9), %v352_v6, %v351_v5  ;;  %v335_v9 = vld [vmem:[%s1347_s1 + $0x10] sm:$0xff] (!%p291_p9)  ;;  %v336_v10 = vld [vmem:[%s1347_s1 + $0x18] sm:$0xff] (!%p291_p9)  ;;  %v353_v11 = vld [vmem:[%s1347_s1 + $0xa0] sm:$0xff] (!%p291_p9)  ;;  %875 = vmatprep.mubr.msk.f32.mxu1 (!%p291_p9), %vm1043_vm1, %v1042_v54  ;;  %vm456_vm2 = vcmask (!%p291_p9), 162816   ;;  %vm551_vm3 = vcmask (!%p291_p9), 1041408   ;;  %s1045_s25 = smov (!%p291_p9), [#allocation2]  }
  0x10   : > { %886 = vmatprep.subr.bf16.mxu0 (!%p291_p9), %v885_v3  ;;  %v354_v12 = vld [vmem:[%s1347_s1 + $0xa8] sm:$0xff] (!%p291_p9)  ;;  %v891_v13 = vpack.c.bf16 (!%p291_p9), %v336_v10, %v335_v9  ;;  %v337_v15 = vld [vmem:[%s1347_s1 + $0x20] sm:$0xff] (!%p291_p9)  ;;  %v355_v17 = vld [vmem:[%s1347_s1 + $0xb0] sm:$0xff] (!%p291_p9)  ;;  %vm1044_vm4 = vmmov (!%p291_p9), 1   ;;  %vm547_vm6 = vcmask (!%p291_p9), 80896  }
  0x11   : > { %888 = vmatpush3.bf16.msra.mxu0 (!%p291_p9), %v887_v7  ;;  %v893_v14 = vpack.c.bf16 (!%p291_p9), %v354_v12, %v353_v11  ;;  %v338_v16 = vld [vmem:[%s1347_s1 + $0x28] sm:$0xff] (!%p291_p9)  ;;  %v356_v18 = vld [vmem:[%s1347_s1 + $0xb8] sm:$0xff] (!%p291_p9)  ;;  %v339_v21 = vld [vmem:[%s1347_s1 + $0x30] sm:$0xff] (!%p291_p9) }
  0x12   : > { %890 = vmatprep.subr.bf16.mxu0 (!%p291_p9), %v889_v8  ;;  %v895_v19 = vpack.c.bf16 (!%p291_p9), %v338_v16, %v337_v15  ;;  %v897_v20 = vpack.c.bf16 (!%p291_p9), %v356_v18, %v355_v17  ;;  %v340_v22 = vld [vmem:[%s1347_s1 + $0x38] sm:$0xff] (!%p291_p9)  ;;  %v357_v23 = vld [vmem:[%s1347_s1 + $0xc0] sm:$0xff] (!%p291_p9)  ;;  %v358_v24 = vld [vmem:[%s1347_s1 + $0xc8] sm:$0xff] (!%p291_p9) }
  0x13   : > { %v899_v26 = vpack.c.bf16 (!%p291_p9), %v340_v22, %v339_v21  ;;  %v901_v27 = vpack.c.bf16 (!%p291_p9), %v358_v24, %v357_v23  ;;  %v341_v28 = vld [vmem:[%s1347_s1 + $0x40] sm:$0xff] (!%p291_p9)  ;;  %v342_v29 = vld [vmem:[%s1347_s1 + $0x48] sm:$0xff] (!%p291_p9)  ;;  %v359_v30 = vld [vmem:[%s1347_s1 + $0xd0] sm:$0xff] (!%p291_p9) }
  0x14   : > { %v360_v31 = vld [vmem:[%s1347_s1 + $0xd8] sm:$0xff] (!%p291_p9)  ;;  %v903_v32 = vpack.c.bf16 (!%p291_p9), %v342_v29, %v341_v28  ;;  %v343_v34 = vld [vmem:[%s1347_s1 + $0x50] sm:$0xff] (!%p291_p9)  ;;  %v361_v36 = vld [vmem:[%s1347_s1 + $0xe0] sm:$0xff] (!%p291_p9)  ;;  %v637_v28 = vlaneseq (!%p291_p9) }
  0x15   : > { %s327_s27 = scalar_select %p326_p10, %s1117_s13, 1  ;;  %892 = vmatpush3.bf16.msra.mxu0 %v891_v13  ;;  %v905_v33 = vpack.c.bf16 %v360_v31, %v359_v30  ;;  %v344_v35 = vld [vmem:[%s1347_s1 + $0x58] sm:$0xff]  ;;  %v362_v37 = vld [vmem:[%s1347_s1 + $0xe8] sm:$0xff]  ;;  %v345_v40 = vld [vmem:[%s1347_s1 + $0x60] sm:$0xff] }
  0x16   : > { %894 = vmatprep.subr.bf16.mxu0 %v893_v14  ;;  %v907_v38 = vpack.c.bf16 %v344_v35, %v343_v34  ;;  %v909_v39 = vpack.c.bf16 %v362_v37, %v361_v36  ;;  %v346_v41 = vld [vmem:[%s1347_s1 + $0x68] sm:$0xff]  ;;  %v363_v42 = vld [vmem:[%s1347_s1 + $0xf0] sm:$0xff]  ;;  %v364_v43 = vld [vmem:[%s1347_s1 + $0xf8] sm:$0xff]  ;;  %v638_v29 = vshrl.u32 %v637_v28, 7 }
  0x17   : > { %s825_s14 = sshll.u32 %s327_s27, 4  ;;  %v911_v44 = vpack.c.bf16 %v346_v41, %v345_v40  ;;  %v913_v45 = vpack.c.bf16 %v364_v43, %v363_v42  ;;  %v347_v46 = vld [vmem:[%s1347_s1 + $0x70] sm:$0xff]  ;;  %v348_v47 = vld [vmem:[%s1347_s1 + $0x78] sm:$0xff]  ;;  %v446_v50 = vld [vmem:[%s1349_s3] sm:$0xff]  ;;  %s826_s27 = sshll.u32 %s1117_s13, 8 }
  0x18   : > { %s1191_s29 = scalar_lea.vmem %s1346_s0, %s825_s14  ;;  %v915_v48 = vpack.c.bf16 %v348_v47, %v347_v46  ;;  %v447_v51 = vld [vmem:[%s1349_s3 + $0x8] sm:$0xff]  ;;  %v448_v55 = vld [vmem:[%s1349_s3 + $0x10] sm:$0xf]  ;;  %v810_v57 = vld [vmem:[%s1348_s2] ss:$0 sm:$0xff]  ;;  %s323_s14 = sand.u32 1, %s1031_s10  }
  0x19   : > { %v332_v25 = vld [vmem:[%s1191_s29 + $0x8] sm:$0xff]  ;;  %896 = vmatpush3.bf16.msra.mxu0 %v895_v19  ;;  %v331_v49 = vld [vmem:[%s1191_s29] sm:$0xff]  ;;  %v918_v52 = vpack.c.bf16 %v447_v51, %v446_v50  ;;  %vm922_vm5 = vmpackc.low %vm551_vm3, %vm1044_vm4  ;;  %s807_s26 = sshll.u32 %s323_s14, 4  ;;  %v639_v30 = vsub.s32 0, %v638_v29  ;;  %s1304_s23 = scalar_lea.hbm %s1355_s9, %s826_s27 }
  0x1a   : > { %436 = vmatprep.mubr.f32.mxu0 %v332_v25  ;;  %898 = vmatprep.subr.bf16.mxu0 %v897_v20  ;;  %v538_v1 = vld [vmem:[%s1351_s5] sm:$0xff]  ;;  %v539_v2 = vld [vmem:[%s1351_s5 + $0x8] sm:$0x3]  ;;  %v632_v13 = vld [vmem:[%s1353_s7 + $0x18] sm:$0xff]  ;;  %s325_s16 = scalar_lea.vmem [#allocation2], %s807_s26  ;;  %s730_s24 = scalar_lea.sflag [#allocation3], %s323_s14 }
  0x1b   : > { %919 = vmatpush3.bf16.msra.mxu1 %v918_v52  ;;  %v921_v3 = vpack.c.bf16 %v539_v2, %v538_v1  ;;  %v811_v4 = vld [vmem:[%s1350_s4] ss:$0 sm:$0xff]  ;;  %v630_v12 = vld [vmem:[%s1353_s7 + $0x8] sm:$0xff]  ;;  %v631_v16 = vld [vmem:[%s1353_s7 + $0x10] sm:$0xff]  ;;  %s744_s17 = sshll.u32 %s325_s16, 4  ;;  %s981_s26 = sshll.u32 %s1045_s25, 4  ;;  %s1306_s17 = int_to_ptr.vmem [resolvable:$true] %s744_s17  ;;  %s982_s26 = int_to_ptr.vmem [resolvable:$false] %s981_s26 }
  0x1c   : > { %873 = vmatprep.subr.mxu1 %v1042_v54  ;;  %v924_v14 = vpack.c.bf16 %v632_v13, %v630_v12  ;;  %v629_v15 = vld [vmem:[%s1353_s7] sm:$0xff]  ;;  %v634_v18 = vld [vmem:[%s1353_s7 + $0x28] sm:$0xf]  ;;  %s977_s13 = scalar_lea.vmem %s1306_s17, 256  ;;  %s983_s29 = scalar_lea.vmem %s982_s26, 512 }
  0x1d   : > { %900 = vmatpush3.bf16.msra.mxu0 %v899_v26  ;;  %v926_v17 = vpack.c.bf16 %v631_v16, %v629_v15  ;;  %v633_v19 = vld [vmem:[%s1353_s7 + $0x20] sm:$0xf]  ;;  %p978_p11 = scmp.ne.s32.totalorder %s1306_s17, %s977_s13  ;;  %p984_p0 = scmp.lt.s32.totalorder %s1306_s17, %s982_s26 }
  0x1e   : > { %902 = vmatprep.subr.bf16.mxu0 %v901_v27  ;;  %v814_v20 = vld [vmem:[%s1352_s6] ss:$0 sm:$0xff]  ;;  %p985_p1 = scmp.lt.s32.totalorder %s983_s29, %s977_s13 }
  0x1f   : > { %874 = vmatpush3.msk.msra.mxu1 %vm460_vm0, %v448_v55  ;;  %v635_v31 = vld [vmem:[%s1354_s8] sm:$0x3]  ;;  %p979_p12 = pnand %p978_p11, %p1134_p5 }
  0x20   : > { %920 = vmatprep.subr.bf16.mxu1 %v1041_v53  ;;  %p986_p2 = por %p985_p1, %p984_p0 }
  0x21   : > { %904 = vmatpush3.bf16.msra.mxu0 %v903_v32  ;;  %v643_v32 = vsub.s32 1, %v638_v29  ;;  %p980_p13 = pneg %p979_p12 }
  0x22   : > { %906 = vmatprep.subr.bf16.mxu0 %v905_v33  ;;  %v640_v33 = vrot.slane %v635_v31, %v639_v30 }
  0x23   : > { %v644_v34 = vrot.slane %v635_v31, %v643_v32  ;;  %p987_p3 = pnand %p986_p2, %p980_p13 }
  0x25   : > { %908 = vmatpush3.bf16.msra.mxu0 %v907_v38 }
  0x26   : > { %910 = vmatprep.subr.bf16.mxu0 %v909_v39 }
  0x29   : > { %912 = vmatpush3.bf16.msra.mxu0 %v911_v44 }
  0x2a   : > { %914 = vmatprep.subr.bf16.mxu0 %v913_v45 }
  0x2d   : > { %916 = vmatpush3.bf16.msra.mxu0 %v915_v48 }
  0x30   : > { %437 = vmatmul.mubr.f32.vlgmr.msra.gmra.mrb[0].mxu0 %v331_v49 }
 0x103   : > { %v859_v56 = vpop.f32.mrb[0].mxu0 }
 0x104   : > { %v860_v58 = vpop.f32.mrb[1].mxu0 }
 0x105   : > { %v861_v59 = vadd.f32 %v860_v58, %v859_v56 }
 0x107   : > { %v439_v60 = vadd.f32 %v861_v59, %v810_v57 }
 0x109   : > { %v442_v61 = vmul.f32 0.5, %v439_v60 }
 0x10b   : > { %971 = vtanh.f32 %v442_v61 }
 0x115   : > { %v972_v62 = vpop.eup %971 }
 0x116   : > { %v444_v63 = vmul.f32 0.5, %v972_v62 }
 0x118   : > { %v445_v0 = vadd.f32 0.5, %v444_v63 }
 0x11a   : > { %876 = vmatmul.mubr.msk.f32.vlgmr.msra.gmra.mrb[0].mxu1 %vm456_vm2, %v445_v0 }
 0x11b   : > { %882 = vmatprep.mubr.msk.f32.mxu1 %vm1043_vm1, %v1042_v54  ;;  %923 = vmatpush3.bf16.msk.msra.mxu1 %vm922_vm5, %v921_v3 }
 0x11c   : > { %925 = vmatprep.subr.bf16.mxu1 %v924_v14 }
 0x1ed   : > { %v530_v5 = vpop.f32.mrb[0].mxu1 }
 0x1ee   : > { %v531_v6 = vadd.f32 %v811_v4, %v530_v5  ;;  %v877_v7 = vpop.f32.mrb[1].mxu1 }
 0x1f0   : > { %v534_v8 = vmul.f32 0.5, %v531_v6 }
 0x1f2   : > { %973 = vtanh.f32 %v534_v8 }
 0x1fc   : > { %v974_v9 = vpop.eup %973 }
 0x1fd   : > { %v536_v10 = vmul.f32 0.5, %v974_v9 }
 0x1ff   : > { %v537_v11 = vadd.f32 0.5, %v536_v10 }
 0x201   : > { %883 = vmatmul.mubr.msk.f32.vlgmr.msra.gmra.mrb[2].mxu1 %vm547_vm6, %v537_v11 }
 0x202   : > { %720 = vmatprep.mubr.f32.mxu1 %v1042_v54  ;;  %927 = vmatpush1.bf16.msra.mxu1 %v926_v17 }
 0x203   : > { %817 = vmatprep.subr.msk.mxu1 %vm460_vm0, %v634_v18 }
 0x206   : > { %818 = vmatpush1.msk.msra.mxu1 %vm460_vm0, %v633_v19 }
 0x2d4   : > { %v621_v21 = vpop.f32.mrb[2].mxu1 }
 0x2d5   : > { %v622_v22 = vadd.f32 %v814_v20, %v621_v21  ;;  %v884_v23 = vpop.f32.mrb[3].mxu1 }
 0x2d7   : > { %v625_v24 = vmul.f32 0.5, %v622_v22 }
 0x2d9   : > { %975 = vtanh.f32 %v625_v24 }
 0x2e3   : > { %v976_v25 = vpop.eup %975 }
 0x2e4   : > { %v627_v26 = vmul.f32 0.5, %v976_v25 }
 0x2e6   : > { %v628_v27 = vadd.f32 0.5, %v627_v26 }
 0x2e8   : > { %819 = vmatmul.mubr.msk.f32.vlgmr.msra.gmra.mrb[4].mxu1 %vm456_vm2, %v628_v27 }
 0x3bb   : > { %v722_v35 = vpop.f32.mrb[4].mxu1 }
 0x3bc   : > { %v723_v36 = vadd.f32 %v722_v35, %v640_v33  ;;  %v724_v37 = vpop.f32.mrb[5].mxu1 }
 0x3bd   : > { %v725_v38 = vadd.f32 %v724_v37, %v644_v34 }
 0x3be   : > { %727 = vst [vmem:[%s325_s16] sm:$0xff] %v723_v36 }
 0x3bf   : > { %728 = vst [vmem:[%s325_s16 + $0x8] sm:$0xff] %v725_v38 }
 0x3c0   : > { %990 = shalt.err (!%p987_p3)
}
 0x3c1   : > { %s991_s14 = scalar_lea.hbm %s1304_s23, 256  ;;  %s995_s16 = scalar_lea.hbm %s1355_s9, 512 }
 0x3c2   : > { %p992_p4 = scmp.ne.s32.totalorder %s1304_s23, %s991_s14  ;;  %p996_p9 = scmp.lt.u32.totalorder %s1304_s23, %s1355_s9 }
 0x3c3   : > { %p997_p10 = scmp.lt.u32.totalorder %s995_s16, %s991_s14  ;;  %p999_p12 = scmp.lt.u32.totalorder %s991_s14, %s1304_s23 }
 0x3c4   : > { %p993_p7 = pnand %p992_p4, %p1134_p5 }
 0x3c5   : > { %p998_p11 = por %p997_p10, %p996_p9 }
 0x3c6   : > { %p994_p8 = pneg %p993_p7 }
 0x3c7   : > { %p1000_p13 = por %p999_p12, %p998_p11 }
 0x3c9   : > { %p1001_p0 = pnand %p1000_p13, %p994_p8 }
 0x3cb   : > { %1004 = shalt.err (!%p1001_p0)
}
 0x3cc   : > { %928 = dma.vmem_to_hbm [thread:$0]  (%p1134_p5), %s1306_s17, 256, %s1304_s23, %s730_s24  }
 0x3cd PF: > { %p934_p1 = scmp.ge.s32.totalorder %s1039_s12, 2  ;;  %s756_s13 = sand.u32 1, %s1027_s30  }
 0x3ce   : > { %s757_s25 = scalar_lea.sflag [#allocation3], %s756_s13 }
 0x3cf   : > { %p931_p2 = pnand %p934_p1, %p1138_p6 }
 0x3d1   : > { %1022 = dma.done.wait (!%p931_p2), %s757_s25, 256  }
 0x3d2   : > { %1024 = vsyncadd (!%p931_p2), %s757_s25, 4294967040  ;;  %p19_p3 = scmp.ge.s32.totalorder %s1121_s15, 4   ;;  %s1358_s30 = smov %s1031_s10 }
 0x3d3   : > { %s1359_s10 = smov %s1035_s11  ;;  %s1360_s11 = smov %s1132_s18 }
 0x3d4   : > { %s1361_s12 = smov %s1121_s15  ;;  %21 = sbr.rel (!%p19_p3) target bundleno = 3 (0x3), region = 91 }
 0x3db   :  { %762 = vsyncpa [#allocation3], 1 }
 0x3dc   :  { %764 = vsyncpa [#allocation3 + $0x1], 1 }

</bundles_post_ra>
